<compile_context>
chip_gen: v7x
topology: tpu7x:2x2x1
jax: 0.10.0
libtpu: 0.0.40
codegen_flags: <defaults>
</compile_context>

<pallas_src>
import functools

import jax
import jax.numpy as jnp
from jax.experimental import pallas as pl
from jax.experimental.pallas import tpu as pltpu


def _deconv_relu_kernel(x_ref, w_ref, b_ref, o_ref):
    # x_ref: (1, C_in, TS)    activations: C_in on sublanes, spatial tile on lanes
    # w_ref: (8*C_out, C_in)  resident weight (constant index_map -> fetched once)
    # b_ref: (8*C_out, 1)     bias column, broadcast along lanes
    # o_ref: (1, 8*C_out, TS) lane-dense output tile
    acc = jnp.dot(w_ref[...], x_ref[0], preferred_element_type=jnp.float32)  # MXU, f32 acc
    acc = acc + b_ref[...]
    o_ref[0] = jnp.maximum(acc, 0.0).astype(o_ref.dtype)


def _cdiv(a, b):
    return -(-a // b)


def _round_up(x, m):
    return ((x + m - 1) // m) * m


def _vmem_budget_bytes():
    # Per-generation VMEM capacity (v5e/v6e: 128 MiB physical, v7x: 64 MiB).
    # Leave headroom for Mosaic internal scratch; cap so v5e/v6e don't go overboard.
    try:
        cap = pltpu.get_tpu_info().vmem_capacity_bytes
    except Exception:
        cap = 64 * 1024 * 1024          # conservative (v7x-sized) fallback
    return min(int(cap * 0.7), 96 * 1024 * 1024)


def _pick_spatial_tile(c_in, c_out, s, n_batch, out_itemsize, vmem_budget):
    """Balanced, lane-dense spatial tile that fits the double-buffered VMEM budget."""
    n_rows = 8 * c_out
    # Double-buffered activation + output tiles scale with the tile width;
    # the resident weight / bias blocks are a fixed cost.
    per_lane = 2 * (c_in * 4 + n_rows * out_itemsize)
    fixed = 2 * (n_rows * c_in * 4 + n_rows * 4)
    ts_max = max(128, (vmem_budget - fixed) // per_lane)
    s128 = _round_up(s, 128)
    ts_max = max(128, min((ts_max // 128) * 128, s128))   # lane-dense, <= padded problem
    n_tiles = _cdiv(s128, ts_max)
    # Keep >= 2 total grid steps so both v7x TensorCores get work.
    if n_batch * n_tiles < 2:
        n_tiles = 2
    # Even 128-aligned tiles -> no mostly-empty trailing tile, better megacore balance.
    ts = _round_up(_cdiv(s128, n_tiles), 128)
    return ts


def upsampling_deconv_block(x, weight, bias, *, out_dtype=jnp.float32, spatial_tile=None):
    """ConvTranspose3d(kernel=2, stride=2, padding=0) + ReLU.

    Args:
      x:      (N, C_in, D, H, W)  float32 (NCDHW, matches PyTorch)
      weight: (C_in, C_out, 2, 2, 2)       (PyTorch ConvTranspose3d layout)
      bias:   (C_out,)
      out_dtype: output/store dtype (f32 matches the module; bf16 halves store traffic,
                 accumulation stays f32 on the MXU either way).
    Returns:
      (N, C_out, 2D, 2H, 2W) in out_dtype
    """
    n, c_in, d, h, w = x.shape
    c_out = weight.shape[1]
    s = d * h * w
    n_rows = 8 * c_out

    out_itemsize = jnp.dtype(out_dtype).itemsize
    vmem_budget = _vmem_budget_bytes()
    ts = spatial_tile if spatial_tile is not None else _pick_spatial_tile(
        c_in, c_out, s, n, out_itemsize, vmem_budget)

    # View activations as (N, C_in, S): a free reshape of NCDHW -- no input transpose.
    x3 = x.reshape(n, c_in, s)
    s_pad = _round_up(s, ts)
    if s_pad != s:
        # Rare, input-sized pad (output padding is sliced off below).
        x3 = jnp.pad(x3, ((0, 0), (0, 0), (0, s_pad - s)))

    # Weight (C_in, C_out, 2,2,2) -> (8*C_out, C_in), rows ordered (co, kd, kh, kw).
    w_mat = jnp.transpose(weight, (1, 2, 3, 4, 0)).reshape(n_rows, c_in)
    # Matching per-row bias (co major -> repeat each bias 8x).
    b_col = jnp.repeat(bias, 8).reshape(n_rows, 1)

    grid = (n, s_pad // ts)
    out_flat = pl.pallas_call(
        _deconv_relu_kernel,
        out_shape=jax.ShapeDtypeStruct((n, n_rows, s_pad), out_dtype),
        grid_spec=pltpu.PrefetchScalarGridSpec(
            num_scalar_prefetch=0,
            grid=grid,
            in_specs=[
                # Streaming activations: lane axis = spatial tile (dense), sublane = C_in.
                pl.BlockSpec((1, c_in, ts), lambda b, i: (b, 0, i)),
                # Resident weight / bias: constant index_map -> DMA'd once, kept in VMEM.
                # (Single K block: K-tiling only pays off for C_in far beyond VNet sizes;
                #  the kernel stays HBM-bound for realistic C_in on v5e/v6e/v7x.)
                pl.BlockSpec((n_rows, c_in), lambda b, i: (0, 0)),
                pl.BlockSpec((n_rows, 1), lambda b, i: (0, 0)),
            ],
            out_specs=pl.BlockSpec((1, n_rows, ts), lambda b, i: (b, 0, i)),
        ),
        compiler_params=pltpu.CompilerParams(
            dimension_semantics=("parallel", "parallel"),
            vmem_limit_bytes=int(vmem_budget),
        ),
    )(x3, w_mat, b_col)

    # Scatter the per-voxel 2x2x2 blocks into the NCDHW upsampled volume.  This is
    # the one remaining HBM layout pass (read+write of the 8x volume), done by XLA.
    # TODO(synk): the stride-2 interleaved NCDHW scatter is not expressible as a
    # lane-dense rectangular Pallas out BlockSpec (the kw/kh interleave must land in
    # the innermost lane axis); a channels-last consumer could take `out_flat`
    # directly and skip this pass entirely.
    y = out_flat[:, :, :s].reshape(n, c_out, 2, 2, 2, d, h, w)
    y = jnp.transpose(y, (0, 1, 5, 2, 6, 3, 7, 4))      # (n, co, d, kd, h, kh, w, kw)
    return y.reshape(n, c_out, 2 * d, 2 * h, 2 * w)


def _reference(x, weight, bias):
    # Pure-JAX reference of ConvTranspose3d(k=2, s=2, p=0) + ReLU.
    n, c_in, d, h, w = x.shape
    c_out = weight.shape[1]
    y_blocks = jnp.einsum("nidhw,iokpq->ndhwkpqo", x, weight) + bias
    y = jnp.transpose(y_blocks, (0, 7, 1, 4, 2, 5, 3, 6)).reshape(
        n, c_out, 2 * d, 2 * h, 2 * w)
    return jnp.maximum(y, 0.0)


if __name__ == "__main__":
    key = jax.random.PRNGKey(0)
    kx, kw, kb = jax.random.split(key, 3)

    # Small but representative decoder-block shapes: 8*C_OUT = 128 rows (sublane-dense),
    # S = D*H*W = 512 spatial voxels per sample (lane-dense tiles).
    N, C_IN, C_OUT, D, H, W = 2, 16, 16, 8, 8, 8
    x = jax.random.normal(kx, (N, C_IN, D, H, W), dtype=jnp.float32)
    # PyTorch ConvTranspose3d weight shape: (C_in, C_out, kD, kH, kW)
    weight = 0.1 * jax.random.normal(kw, (C_IN, C_OUT, 2, 2, 2), dtype=jnp.float32)
    bias = 0.1 * jax.random.normal(kb, (C_OUT,), dtype=jnp.float32)

    y_ref = _reference(x, weight, bias)

    # f32 path (exactly matches the PyTorch module semantics).
    fn = jax.jit(upsampling_deconv_block)
    y = fn(x, weight, bias)
    jax.block_until_ready(y)
    assert y.shape == (N, C_OUT, 2 * D, 2 * H, 2 * W)
    assert jnp.allclose(y, y_ref, atol=1e-4, rtol=1e-4)

    # bf16 stores (f32 accumulation in-kernel): halves output HBM traffic.
    fn_bf16 = jax.jit(functools.partial(upsampling_deconv_block, out_dtype=jnp.bfloat16))
    y16 = fn_bf16(x, weight, bias)
    jax.block_until_ready(y16)
    assert y16.dtype == jnp.bfloat16
    assert jnp.allclose(y16.astype(jnp.float32), y_ref, atol=3e-2, rtol=3e-2)

    print("KERNEL_OK")
</pallas_src>

<mosaic_0001>
module attributes {stable_mosaic.version = 11 : i64} {
  func.func @_deconv_relu_kernel(%arg0: i32, %arg1: i32, %arg2: memref<1x16x512xf32, #tpu.memory_space<vmem>>, %arg3: memref<128x16xf32, #tpu.memory_space<vmem>>, %arg4: memref<128x1xf32, #tpu.memory_space<vmem>>, %arg5: memref<1x128x512xf32, #tpu.memory_space<vmem>>) attributes {dimension_semantics = [#tpu.dimension_semantics<parallel>, #tpu.dimension_semantics<parallel>], iteration_bounds = array<i64: 2, 1>, scalar_prefetch = 0 : i64, scratch_operands = 0 : i64, tpu.core_type = #tpu.core_type<tc>, window_params = [{transform_indices = @transform_0, window_bounds = array<i64: 1, 16, 512>}, {pipeline_mode = #tpu.pipeline_mode<synchronous>, transform_indices = @transform_1, window_bounds = array<i64: 128, 16>}, {pipeline_mode = #tpu.pipeline_mode<synchronous>, transform_indices = @transform_2, window_bounds = array<i64: 128, 1>}, {transform_indices = @transform_3, window_bounds = array<i64: 1, 128, 512>}]} {
    %c0 = arith.constant 0 : index
    %c0_0 = arith.constant 0 : index
    %0 = vector.load %arg3[%c0, %c0_0] : memref<128x16xf32, #tpu.memory_space<vmem>>, vector<128x16xf32>
    %c0_1 = arith.constant 0 : index
    %c0_2 = arith.constant 0 : index
    %c0_3 = arith.constant 0 : index
    %1 = vector.load %arg2[%c0_1, %c0_2, %c0_3] : memref<1x16x512xf32, #tpu.memory_space<vmem>>, vector<1x16x512xf32>
    %2 = vector.shape_cast %1 : vector<1x16x512xf32> to vector<16x512xf32>
    %cst = arith.constant dense<0.000000e+00> : vector<128x512xf32>
    %3 = tpu.matmul %0, %2, %cst {dimension_numbers = #tpu.dot_dimension_numbers<[1], [0], [0], [1], [0, 0, 1, 1], [], []>} : vector<128x16xf32>, vector<16x512xf32>, vector<128x512xf32> -> vector<128x512xf32>
    %c0_4 = arith.constant 0 : index
    %c0_5 = arith.constant 0 : index
    %4 = vector.load %arg4[%c0_4, %c0_5] : memref<128x1xf32, #tpu.memory_space<vmem>>, vector<128x1xf32>
    %5 = vector.broadcast %4 : vector<128x1xf32> to vector<128x512xf32>
    %6 = arith.addf %3, %5 : vector<128x512xf32>
    %cst_6 = arith.constant 0.000000e+00 : f32
    %7 = vector.broadcast %cst_6 : f32 to vector<128x512xf32>
    %8 = arith.maximumf %6, %7 : vector<128x512xf32>
    %c0_7 = arith.constant 0 : index
    %c0_8 = arith.constant 0 : index
    %c0_9 = arith.constant 0 : index
    %9 = vector.load %arg5[%c0_7, %c0_8, %c0_9] : memref<1x128x512xf32, #tpu.memory_space<vmem>>, vector<1x128x512xf32>
    %10 = vector.shape_cast %9 : vector<1x128x512xf32> to vector<128x512xf32>
    %11 = vector.shape_cast %8 : vector<128x512xf32> to vector<1x128x512xf32>
    tpu.vector_store %arg5[%c0_7, %c0_8, %c0_9], %11 {strides = array<i32>} : memref<1x128x512xf32, #tpu.memory_space<vmem>>, vector<1x128x512xf32>,
    return
  }
  func.func @transform_0(%arg0: i32, %arg1: i32) -> (i32, i32, i32) {
    %c0_i32 = arith.constant 0 : i32
    %c0_i32_0 = arith.constant 0 : i32
    return %arg0, %c0_i32, %arg1 : i32, i32, i32
  }
  func.func @transform_1(%arg0: i32, %arg1: i32) -> (i32, i32) {
    %c0_i32 = arith.constant 0 : i32
    %c0_i32_0 = arith.constant 0 : i32
    %c0_i32_1 = arith.constant 0 : i32
    return %c0_i32, %c0_i32_0 : i32, i32
  }
  func.func @transform_2(%arg0: i32, %arg1: i32) -> (i32, i32) {
    %c0_i32 = arith.constant 0 : i32
    %c0_i32_0 = arith.constant 0 : i32
    %c0_i32_1 = arith.constant 0 : i32
    return %c0_i32, %c0_i32_0 : i32, i32
  }
  func.func @transform_3(%arg0: i32, %arg1: i32) -> (i32, i32, i32) {
    %c0_i32 = arith.constant 0 : i32
    %c0_i32_0 = arith.constant 0 : i32
    return %arg0, %c0_i32, %arg1 : i32, i32, i32
  }
}

</mosaic_0001>

<bundles_post_ra>
// kernel: upsampling_deconv_block.1
= control target key start
LH: loop header
LB: loop body
LE: loop exit
PB: predicated region body
PF: predicated region fallthrough
CT: control target
= control target key end

     0   :  { %s1043_s12 = smov 0   ;;  %s1045_s13 = smov 0   ;;  %s1306_s0 = inlined_call_operand.vmem [shape: f32[2,16,512], index: 0, kind: input, shape index: {}]   ;;  %s1307_s1 = inlined_call_operand.vmem [shape: f32[128,16], index: 1, kind: input, shape index: {}]   ;;  %s1308_s2 = inlined_call_operand.vmem [shape: f32[128,1], index: 2, kind: input, shape index: {}]   ;;  %s1309_s3 = inlined_call_operand.vmem [shape: f32[2,128,512], index: 3, kind: output, shape index: {}]  }
   0x1   :  { %s1047_s14 = smov 0  }
   0x2 LB: > { %s25_s15 = sadd.s32 1, %s1015_s13  ;;  %p920_p0 = scmp.ge.s32.totalorder %s1019_s14, 1  ;;  %s1019_s14 = sphi %s1047_s14, %s13_s14   ;;  %s1015_s13 = sphi %s1045_s13, %s1311_s13   ;;  %s1011_s12 = sphi %s1043_s12, %s1310_s12  }
   0x3   : > { %p27_p1 = scmp.ge.s32.totalorder %s25_s15, 2  ;;  %p158_p2 = scmp.lt.s32.totalorder %s1019_s14, 3 }
   0x5   : > { %s1313_s15 = smov (%p27_p1, %s25_s15), 0  ;;  %p159_p3 = pnand %p920_p0, %p158_p2 }
   0x6   : > { %p191_p4 = scmp.lt.s32.totalorder (!%p159_p3), %s1011_s12, 1  ;;  %v1021_v0 = vmov (!%p159_p3), 0.0   ;;  %v1022_v1 = vmov (!%p159_p3), 0   ;;  %v234_v2 = vld [vmem:[%s1308_s2] sm:$0xff] (!%p159_p3)  ;;  %v235_v6 = vld [vmem:[%s1308_s2 + $0x8] sm:$0xff] (!%p159_p3)  ;;  %v236_v15 = vld [vmem:[%s1308_s2 + $0x10] sm:$0xff] (!%p159_p3) }
   0x7   : > { %162 = sbr.rel (%p159_p3) target bundleno = 304 (0x130), region = 32  ;;  %443 = vmatprep.mubr.f32.mxu0 (!%p159_p3), %v1021_v0  ;;  %604 = vmatprep.mubr.f32.mxu1 (!%p159_p3), %v1021_v0  ;;  %v210_v17 = vld [vmem:[%s1307_s1] sm:$0xff] (!%p159_p3)  ;;  %vm330_vm0 = vcmask (!%p159_p3), 130048   ;;  %v237_v18 = vld [vmem:[%s1308_s2 + $0x18] sm:$0xff] (!%p159_p3)  ;;  %v211_v20 = vld [vmem:[%s1307_s1 + $0x8] sm:$0xff] (!%p159_p3) }
   0x8   : > { %995 = vset.pattern.permute.xlu0 (!%p159_p3), %v1022_v1  ;;  %996 = vset.pattern.permute.xlu1 (!%p159_p3), %v1022_v1  ;;  %v238_v19 = vld [vmem:[%s1308_s2 + $0x20] sm:$0xff] (!%p159_p3)  ;;  %v239_v21 = vld [vmem:[%s1308_s2 + $0x28] sm:$0xff] (!%p159_p3)  ;;  %v240_v22 = vld [vmem:[%s1308_s2 + $0x30] sm:$0xff] (!%p159_p3) }
   0x9   : > { %252 = vperm.xlu0 (!%p159_p3), %995, %v234_v2   ;;  %262 = vperm.xlu1 (!%p159_p3), %996, %v236_v15   ;;  %v212_v23 = vld [vmem:[%s1307_s1 + $0x10] sm:$0xff] (!%p159_p3)  ;;  %v241_v24 = vld [vmem:[%s1308_s2 + $0x38] sm:$0xff] (!%p159_p3)  ;;  %v242_v25 = vld [vmem:[%s1308_s2 + $0x40] sm:$0xff] (!%p159_p3) }
   0xa   : > { %v213_v26 = vld [vmem:[%s1307_s1 + $0x18] sm:$0xff] (!%p159_p3)  ;;  %v243_v27 = vld [vmem:[%s1308_s2 + $0x48] sm:$0xff] (!%p159_p3)  ;;  %v244_v28 = vld [vmem:[%s1308_s2 + $0x50] sm:$0xff] (!%p159_p3) }
   0xb   : > { %v214_v29 = vld [vmem:[%s1307_s1 + $0x20] sm:$0xff] (!%p159_p3)  ;;  %v245_v30 = vld [vmem:[%s1308_s2 + $0x58] sm:$0xff] (!%p159_p3)  ;;  %v215_v32 = vld [vmem:[%s1307_s1 + $0x28] sm:$0xff] (!%p159_p3) }
   0xc   : > { %v246_v31 = vld [vmem:[%s1308_s2 + $0x60] sm:$0xff] (!%p159_p3)  ;;  %v247_v33 = vld [vmem:[%s1308_s2 + $0x68] sm:$0xff] (!%p159_p3)  ;;  %v248_v34 = vld [vmem:[%s1308_s2 + $0x70] sm:$0xff] (!%p159_p3) }
   0xd   : > { %257 = vperm.xlu0 (!%p159_p3), %995, %v235_v6   ;;  %267 = vperm.xlu1 (!%p159_p3), %996, %v237_v18   ;;  %v216_v35 = vld [vmem:[%s1307_s1 + $0x30] sm:$0xff] (!%p159_p3)  ;;  %v249_v36 = vld [vmem:[%s1308_s2 + $0x78] sm:$0xff] (!%p159_p3)  ;;  %v218_v38 = vld [vmem:[%s1307_s1 + $0x40] sm:$0xff] (!%p159_p3) }
   0xe   : > { %s1315_s12 = smov (!%p191_p4, %s1011_s12), 1  ;;  %v217_v37 = vld [vmem:[%s1307_s1 + $0x38] sm:$0xff]  ;;  %v219_v39 = vld [vmem:[%s1307_s1 + $0x48] sm:$0xff]  ;;  %v220_v40 = vld [vmem:[%s1307_s1 + $0x50] sm:$0xff] }
   0xf   : > { %s959_s16 = sshll.u32 %s1315_s12, 6  ;;  %v221_v41 = vld [vmem:[%s1307_s1 + $0x58] sm:$0xff]  ;;  %v222_v42 = vld [vmem:[%s1307_s1 + $0x60] sm:$0xff]  ;;  %v223_v43 = vld [vmem:[%s1307_s1 + $0x68] sm:$0xff]  ;;  %s960_s11 = sshll.u32 %s1315_s12, 9 }
  0x10   : > { %s198_s19 = scalar_lea.vmem %s1306_s0, %s959_s16  ;;  %v224_v44 = vld [vmem:[%s1307_s1 + $0x70] sm:$0xff]  ;;  %v225_v45 = vld [vmem:[%s1307_s1 + $0x78] sm:$0xff]  ;;  %s1231_s18 = scalar_lea.vmem %s1309_s3, %s960_s11 }
  0x11   : > { %v227_v3 = vld [vmem:[%s198_s19 + $0x8] sm:$0xff]  ;;  %v229_v5 = vld [vmem:[%s198_s19 + $0x18] sm:$0xff]  ;;  %v226_v9 = vld [vmem:[%s198_s19] sm:$0xff]  ;;  %272 = vperm.xlu0 %995, %v238_v19   ;;  %277 = vperm.xlu1 %996, %v239_v21  }
  0x12   : > { %v231_v4 = vld [vmem:[%s198_s19 + $0x28] sm:$0xff]  ;;  %v233_v8 = vld [vmem:[%s198_s19 + $0x38] sm:$0xff]  ;;  %v230_v10 = vld [vmem:[%s198_s19 + $0x20] sm:$0xff] }
  0x13   : > { %v961_v7 = vpack.c.bf16 %v231_v4, %v227_v3  ;;  %v965_v11 = vpack.c.bf16 %v233_v8, %v229_v5  ;;  %v963_v12 = vpack.c.bf16 %v230_v10, %v226_v9  ;;  %v228_v13 = vld [vmem:[%s198_s19 + $0x10] sm:$0xff] }
  0x14   : > { %v232_v14 = vld [vmem:[%s198_s19 + $0x30] sm:$0xff] }
  0x15   : > { %962 = vmatprep.subr.bf16.mxu0 %v961_v7  ;;  %v967_v16 = vpack.c.bf16 %v232_v14, %v228_v13  ;;  %966 = vmatprep.subr.bf16.mxu1 %v965_v11 }
  0x16   : > { %964 = vmatpush1.bf16.msra.mxu0 %v963_v12  ;;  %282 = vperm.xlu0 %995, %v240_v22  }
  0x17   : > { %968 = vmatpush1.bf16.msra.mxu1 %v967_v16  ;;  %287 = vperm.xlu1 %996, %v241_v24  }
  0x19   : > { %925 = vmatmul.mubr.msk.f32.vlgmr.msra.gmra.mrb[0].mxu0 %vm330_vm0, %v210_v17 }
  0x1a   : > { %941 = vmatmul.mubr.msk.f32.vlgmr.msra.gmra.mrb[0].mxu1 %vm330_vm0, %v210_v17  ;;  %449 = vmatprep.mubr.f32.mxu0 %v1021_v0 }
  0x1b   : > { %610 = vmatprep.mubr.f32.mxu1 %v1021_v0  ;;  %292 = vperm.xlu0 %995, %v242_v25  }
  0x1c   : > { %297 = vperm.xlu1 %996, %v243_v27  }
  0x1d   : > { %926 = vmatmul.mubr.msk.f32.gmra.mrb[2].mxu0 %vm330_vm0, %v211_v20 }
  0x1e   : > { %942 = vmatmul.mubr.msk.f32.gmra.mrb[2].mxu1 %vm330_vm0, %v211_v20  ;;  %455 = vmatprep.mubr.f32.mxu0 %v1021_v0 }
  0x1f   : > { %616 = vmatprep.mubr.f32.mxu1 %v1021_v0  ;;  %302 = vperm.xlu0 %995, %v244_v28  }
  0x20   : > { %307 = vperm.xlu1 %996, %v245_v30  }
  0x21   : > { %927 = vmatmul.mubr.msk.f32.gmra.mrb[4].mxu0 %vm330_vm0, %v212_v23 }
  0x22   : > { %943 = vmatmul.mubr.msk.f32.gmra.mrb[4].mxu1 %vm330_vm0, %v212_v23  ;;  %461 = vmatprep.mubr.f32.mxu0 %v1021_v0 }
  0x23   : > { %622 = vmatprep.mubr.f32.mxu1 %v1021_v0  ;;  %312 = vperm.xlu0 %995, %v246_v31  }
  0x24   : > { %317 = vperm.xlu1 %996, %v247_v33  }
  0x25   : > { %928 = vmatmul.mubr.msk.f32.gmra.mrb[6].mxu0 %vm330_vm0, %v213_v26 }
  0x26   : > { %944 = vmatmul.mubr.msk.f32.gmra.mrb[6].mxu1 %vm330_vm0, %v213_v26  ;;  %467 = vmatprep.mubr.f32.mxu0 %v1021_v0 }
  0x27   : > { %628 = vmatprep.mubr.f32.mxu1 %v1021_v0  ;;  %322 = vperm.xlu0 %995, %v248_v34  }
  0x28   : > { %327 = vperm.xlu1 %996, %v249_v36  }
  0x29   : > { %929 = vmatmul.mubr.msk.f32.gmra.mrb[8].mxu0 %vm330_vm0, %v214_v29 }
  0x2a   : > { %945 = vmatmul.mubr.msk.f32.gmra.mrb[8].mxu1 %vm330_vm0, %v214_v29  ;;  %473 = vmatprep.mubr.f32.mxu0 %v1021_v0 }
  0x2b   : > { %634 = vmatprep.mubr.f32.mxu1 %v1021_v0 }
  0x2d   : > { %930 = vmatmul.mubr.msk.f32.gmra.mrb[10].mxu0 %vm330_vm0, %v215_v32 }
  0x2e   : > { %946 = vmatmul.mubr.msk.f32.gmra.mrb[10].mxu1 %vm330_vm0, %v215_v32  ;;  %479 = vmatprep.mubr.f32.mxu0 %v1021_v0 }
  0x2f   : > { %640 = vmatprep.mubr.f32.mxu1 %v1021_v0 }
  0x31   : > { %931 = vmatmul.mubr.msk.f32.gmra.mrb[12].mxu0 %vm330_vm0, %v216_v35 }
  0x32   : > { %947 = vmatmul.mubr.msk.f32.gmra.mrb[12].mxu1 %vm330_vm0, %v216_v35  ;;  %485 = vmatprep.mubr.f32.mxu0 %v1021_v0 }
  0x33   : > { %646 = vmatprep.mubr.f32.mxu1 %v1021_v0 }
  0x35   : > { %932 = vmatmul.mubr.msk.f32.gmra.mrb[14].mxu0 %vm330_vm0, %v217_v37 }
  0x36   : > { %948 = vmatmul.mubr.msk.f32.gmra.mrb[14].mxu1 %vm330_vm0, %v217_v37  ;;  %491 = vmatprep.mubr.f32.mxu0 %v1021_v0 }
  0x37   : > { %652 = vmatprep.mubr.f32.mxu1 %v1021_v0 }
  0x39   : > { %933 = vmatmul.mubr.msk.f32.gmra.mrb[16].mxu0 %vm330_vm0, %v218_v38 }
  0x3a   : > { %949 = vmatmul.mubr.msk.f32.gmra.mrb[16].mxu1 %vm330_vm0, %v218_v38  ;;  %497 = vmatprep.mubr.f32.mxu0 %v1021_v0 }
  0x3b   : > { %658 = vmatprep.mubr.f32.mxu1 %v1021_v0 }
  0x3d   : > { %934 = vmatmul.mubr.msk.f32.gmra.mrb[18].mxu0 %vm330_vm0, %v219_v39 }
  0x3e   : > { %950 = vmatmul.mubr.msk.f32.gmra.mrb[18].mxu1 %vm330_vm0, %v219_v39  ;;  %503 = vmatprep.mubr.f32.mxu0 %v1021_v0 }
  0x3f   : > { %664 = vmatprep.mubr.f32.mxu1 %v1021_v0 }
  0x41   : > { %935 = vmatmul.mubr.msk.f32.gmra.mrb[20].mxu0 %vm330_vm0, %v220_v40 }
  0x42   : > { %951 = vmatmul.mubr.msk.f32.gmra.mrb[20].mxu1 %vm330_vm0, %v220_v40  ;;  %509 = vmatprep.mubr.f32.mxu0 %v1021_v0 }
  0x43   : > { %670 = vmatprep.mubr.f32.mxu1 %v1021_v0 }
  0x45   : > { %936 = vmatmul.mubr.msk.f32.gmra.mrb[22].mxu0 %vm330_vm0, %v221_v41 }
  0x46   : > { %952 = vmatmul.mubr.msk.f32.gmra.mrb[22].mxu1 %vm330_vm0, %v221_v41  ;;  %515 = vmatprep.mubr.f32.mxu0 %v1021_v0 }
  0x47   : > { %676 = vmatprep.mubr.f32.mxu1 %v1021_v0 }
  0x49   : > { %937 = vmatmul.mubr.msk.f32.gmra.mrb[24].mxu0 %vm330_vm0, %v222_v42 }
  0x4a   : > { %953 = vmatmul.mubr.msk.f32.gmra.mrb[24].mxu1 %vm330_vm0, %v222_v42  ;;  %521 = vmatprep.mubr.f32.mxu0 %v1021_v0 }
  0x4b   : > { %682 = vmatprep.mubr.f32.mxu1 %v1021_v0 }
  0x4d   : > { %938 = vmatmul.mubr.msk.f32.gmra.mrb[26].mxu0 %vm330_vm0, %v223_v43 }
  0x4e   : > { %954 = vmatmul.mubr.msk.f32.gmra.mrb[26].mxu1 %vm330_vm0, %v223_v43  ;;  %527 = vmatprep.mubr.f32.mxu0 %v1021_v0 }
  0x4f   : > { %688 = vmatprep.mubr.f32.mxu1 %v1021_v0 }
  0x51   : > { %939 = vmatmul.mubr.msk.f32.gmra.mrb[28].mxu0 %vm330_vm0, %v224_v44 }
  0x52   : > { %955 = vmatmul.mubr.msk.f32.gmra.mrb[28].mxu1 %vm330_vm0, %v224_v44  ;;  %533 = vmatprep.mubr.f32.mxu0 %v1021_v0 }
  0x53   : > { %694 = vmatprep.mubr.f32.mxu1 %v1021_v0 }
  0x55   : > { %940 = vmatmul.mubr.msk.f32.gmra.mrb[30].mxu0 %vm330_vm0, %v225_v45 }
  0x56   : > { %956 = vmatmul.mubr.msk.f32.gmra.mrb[30].mxu1 %vm330_vm0, %v225_v45 }
  0x88   : > { %v253_v46 = vpop.permute.xlu0 %252  ;;  %v263_v1 = vpop.permute.xlu1 %262 }
  0x8c   : > { %v258_v54 = vpop.permute.xlu0 %257  ;;  %v268_v19 = vpop.permute.xlu1 %267 }
  0x90   : > { %v273_v32 = vpop.permute.xlu0 %272  ;;  %v278_v44 = vpop.permute.xlu1 %277 }
  0xec   : > { %v445_v47 = vpop.f32.mrb[0].mxu0 }
  0xed   : > { %v446_v48 = vadd.f32 %v445_v47, %v253_v46  ;;  %v606_v49 = vpop.f32.mrb[0].mxu1  ;;  %v447_v50 = vpop.f32.mrb[1].mxu0 }
  0xee   : > { %v607_v51 = vadd.f32 %v606_v49, %v253_v46  ;;  %v448_v52 = vadd.f32 %v447_v50, %v253_v46  ;;  %v608_v53 = vpop.f32.mrb[1].mxu1 }
  0xef   : > { %v701_v55 = vmax.f32 %v446_v48, 0.0  ;;  %v609_v56 = vadd.f32 %v608_v53, %v253_v46 }
  0xf0   : > { %v703_v57 = vmax.f32 %v607_v51, 0.0  ;;  %v702_v58 = vmax.f32 %v448_v52, 0.0  ;;  %v451_v59 = vpop.f32.mrb[2].mxu0 }
  0xf1   : > { %765 = vst [vmem:[%s1231_s18] sm:$0xff] %v701_v55  ;;  %v704_v60 = vmax.f32 %v609_v56, 0.0  ;;  %v452_v61 = vadd.f32 %v451_v59, %v258_v54  ;;  %v612_v62 = vpop.f32.mrb[2].mxu1  ;;  %v453_v63 = vpop.f32.mrb[3].mxu0 }
  0xf2   : > { %767 = vst [vmem:[%s1231_s18 + $0x10] sm:$0xff] %v703_v57  ;;  %766 = vst [vmem:[%s1231_s18 + $0x8] sm:$0xff] %v702_v58  ;;  %v613_v0 = vadd.f32 %v612_v62, %v258_v54  ;;  %v454_v2 = vadd.f32 %v453_v63, %v258_v54  ;;  %v614_v3 = vpop.f32.mrb[3].mxu1  ;;  %v283_v57 = vpop.permute.xlu0 %282 }
  0xf3   : > { %768 = vst [vmem:[%s1231_s18 + $0x18] sm:$0xff] %v704_v60  ;;  %v705_v4 = vmax.f32 %v452_v61, 0.0  ;;  %v615_v5 = vadd.f32 %v614_v3, %v258_v54 }
  0xf4   : > { %v707_v6 = vmax.f32 %v613_v0, 0.0  ;;  %v706_v7 = vmax.f32 %v454_v2, 0.0  ;;  %v457_v8 = vpop.f32.mrb[4].mxu0 }
  0xf5   : > { %769 = vst [vmem:[%s1231_s18 + $0x20] sm:$0xff] %v705_v4  ;;  %v708_v9 = vmax.f32 %v615_v5, 0.0  ;;  %v458_v10 = vadd.f32 %v457_v8, %v263_v1  ;;  %v618_v11 = vpop.f32.mrb[4].mxu1  ;;  %v459_v12 = vpop.f32.mrb[5].mxu0 }
  0xf6   : > { %771 = vst [vmem:[%s1231_s18 + $0x30] sm:$0xff] %v707_v6  ;;  %770 = vst [vmem:[%s1231_s18 + $0x28] sm:$0xff] %v706_v7  ;;  %v619_v13 = vadd.f32 %v618_v11, %v263_v1  ;;  %v460_v14 = vadd.f32 %v459_v12, %v263_v1  ;;  %v620_v15 = vpop.f32.mrb[5].mxu1  ;;  %v288_v6 = vpop.permute.xlu1 %287 }
  0xf7   : > { %772 = vst [vmem:[%s1231_s18 + $0x38] sm:$0xff] %v708_v9  ;;  %v709_v16 = vmax.f32 %v458_v10, 0.0  ;;  %v621_v17 = vadd.f32 %v620_v15, %v263_v1 }
  0xf8   : > { %v711_v18 = vmax.f32 %v619_v13, 0.0  ;;  %v710_v20 = vmax.f32 %v460_v14, 0.0  ;;  %v463_v21 = vpop.f32.mrb[6].mxu0 }
  0xf9   : > { %773 = vst [vmem:[%s1231_s18 + $0x40] sm:$0xff] %v709_v16  ;;  %v712_v22 = vmax.f32 %v621_v17, 0.0  ;;  %v464_v23 = vadd.f32 %v463_v21, %v268_v19  ;;  %v624_v24 = vpop.f32.mrb[6].mxu1  ;;  %v465_v25 = vpop.f32.mrb[7].mxu0 }
  0xfa   : > { %775 = vst [vmem:[%s1231_s18 + $0x50] sm:$0xff] %v711_v18  ;;  %774 = vst [vmem:[%s1231_s18 + $0x48] sm:$0xff] %v710_v20  ;;  %v625_v26 = vadd.f32 %v624_v24, %v268_v19  ;;  %v466_v27 = vadd.f32 %v465_v25, %v268_v19  ;;  %v626_v28 = vpop.f32.mrb[7].mxu1 }
  0xfb   : > { %776 = vst [vmem:[%s1231_s18 + $0x58] sm:$0xff] %v712_v22  ;;  %v713_v29 = vmax.f32 %v464_v23, 0.0  ;;  %v627_v30 = vadd.f32 %v626_v28, %v268_v19  ;;  %v293_v19 = vpop.permute.xlu0 %292 }
  0xfc   : > { %v715_v31 = vmax.f32 %v625_v26, 0.0  ;;  %v714_v33 = vmax.f32 %v466_v27, 0.0  ;;  %v469_v34 = vpop.f32.mrb[8].mxu0 }
  0xfd   : > { %777 = vst [vmem:[%s1231_s18 + $0x60] sm:$0xff] %v713_v29  ;;  %v716_v35 = vmax.f32 %v627_v30, 0.0  ;;  %v470_v36 = vadd.f32 %v469_v34, %v273_v32  ;;  %v630_v37 = vpop.f32.mrb[8].mxu1  ;;  %v471_v38 = vpop.f32.mrb[9].mxu0 }
  0xfe   : > { %779 = vst [vmem:[%s1231_s18 + $0x70] sm:$0xff] %v715_v31  ;;  %778 = vst [vmem:[%s1231_s18 + $0x68] sm:$0xff] %v714_v33  ;;  %v631_v39 = vadd.f32 %v630_v37, %v273_v32  ;;  %v472_v40 = vadd.f32 %v471_v38, %v273_v32  ;;  %v632_v41 = vpop.f32.mrb[9].mxu1 }
  0xff   : > { %780 = vst [vmem:[%s1231_s18 + $0x78] sm:$0xff] %v716_v35  ;;  %v717_v42 = vmax.f32 %v470_v36, 0.0  ;;  %v633_v43 = vadd.f32 %v632_v41, %v273_v32  ;;  %v298_v32 = vpop.permute.xlu1 %297 }
 0x100   : > { %v719_v45 = vmax.f32 %v631_v39, 0.0  ;;  %v718_v46 = vmax.f32 %v472_v40, 0.0  ;;  %v475_v47 = vpop.f32.mrb[10].mxu0 }
 0x101   : > { %781 = vst [vmem:[%s1231_s18 + $0x80] sm:$0xff] %v717_v42  ;;  %v720_v48 = vmax.f32 %v633_v43, 0.0  ;;  %v476_v49 = vadd.f32 %v475_v47, %v278_v44  ;;  %v636_v50 = vpop.f32.mrb[10].mxu1  ;;  %v477_v51 = vpop.f32.mrb[11].mxu0 }
 0x102   : > { %783 = vst [vmem:[%s1231_s18 + $0x90] sm:$0xff] %v719_v45  ;;  %782 = vst [vmem:[%s1231_s18 + $0x88] sm:$0xff] %v718_v46  ;;  %v637_v52 = vadd.f32 %v636_v50, %v278_v44  ;;  %v478_v53 = vadd.f32 %v477_v51, %v278_v44  ;;  %v638_v54 = vpop.f32.mrb[11].mxu1  ;;  %v303_v45 = vpop.permute.xlu0 %302 }
 0x103   : > { %784 = vst [vmem:[%s1231_s18 + $0x98] sm:$0xff] %v720_v48  ;;  %v721_v55 = vmax.f32 %v476_v49, 0.0  ;;  %v639_v56 = vadd.f32 %v638_v54, %v278_v44 }
 0x104   : > { %v723_v58 = vmax.f32 %v637_v52, 0.0  ;;  %v722_v59 = vmax.f32 %v478_v53, 0.0  ;;  %v481_v60 = vpop.f32.mrb[12].mxu0 }
 0x105   : > { %785 = vst [vmem:[%s1231_s18 + $0xa0] sm:$0xff] %v721_v55  ;;  %v724_v61 = vmax.f32 %v639_v56, 0.0  ;;  %v482_v62 = vadd.f32 %v481_v60, %v283_v57  ;;  %v642_v63 = vpop.f32.mrb[12].mxu1  ;;  %v483_v0 = vpop.f32.mrb[13].mxu0 }
 0x106   : > { %787 = vst [vmem:[%s1231_s18 + $0xb0] sm:$0xff] %v723_v58  ;;  %786 = vst [vmem:[%s1231_s18 + $0xa8] sm:$0xff] %v722_v59  ;;  %v643_v1 = vadd.f32 %v642_v63, %v283_v57  ;;  %v484_v2 = vadd.f32 %v483_v0, %v283_v57  ;;  %v644_v3 = vpop.f32.mrb[13].mxu1  ;;  %v308_v58 = vpop.permute.xlu1 %307 }
 0x107   : > { %788 = vst [vmem:[%s1231_s18 + $0xb8] sm:$0xff] %v724_v61  ;;  %v725_v4 = vmax.f32 %v482_v62, 0.0  ;;  %v645_v5 = vadd.f32 %v644_v3, %v283_v57 }
 0x108   : > { %v727_v7 = vmax.f32 %v643_v1, 0.0  ;;  %v726_v8 = vmax.f32 %v484_v2, 0.0  ;;  %v487_v9 = vpop.f32.mrb[14].mxu0 }
 0x109   : > { %789 = vst [vmem:[%s1231_s18 + $0xc0] sm:$0xff] %v725_v4  ;;  %v728_v10 = vmax.f32 %v645_v5, 0.0  ;;  %v488_v11 = vadd.f32 %v487_v9, %v288_v6  ;;  %v648_v12 = vpop.f32.mrb[14].mxu1  ;;  %v489_v13 = vpop.f32.mrb[15].mxu0 }
 0x10a   : > { %791 = vst [vmem:[%s1231_s18 + $0xd0] sm:$0xff] %v727_v7  ;;  %790 = vst [vmem:[%s1231_s18 + $0xc8] sm:$0xff] %v726_v8  ;;  %v649_v14 = vadd.f32 %v648_v12, %v288_v6  ;;  %v490_v15 = vadd.f32 %v489_v13, %v288_v6  ;;  %v650_v16 = vpop.f32.mrb[15].mxu1  ;;  %v313_v7 = vpop.permute.xlu0 %312 }
 0x10b   : > { %792 = vst [vmem:[%s1231_s18 + $0xd8] sm:$0xff] %v728_v10  ;;  %v729_v17 = vmax.f32 %v488_v11, 0.0  ;;  %v651_v18 = vadd.f32 %v650_v16, %v288_v6 }
 0x10c   : > { %v731_v20 = vmax.f32 %v649_v14, 0.0  ;;  %v730_v21 = vmax.f32 %v490_v15, 0.0  ;;  %v493_v22 = vpop.f32.mrb[16].mxu0 }
 0x10d   : > { %793 = vst [vmem:[%s1231_s18 + $0xe0] sm:$0xff] %v729_v17  ;;  %v732_v23 = vmax.f32 %v651_v18, 0.0  ;;  %v494_v24 = vadd.f32 %v493_v22, %v293_v19  ;;  %v654_v25 = vpop.f32.mrb[16].mxu1  ;;  %v495_v26 = vpop.f32.mrb[17].mxu0 }
 0x10e   : > { %795 = vst [vmem:[%s1231_s18 + $0xf0] sm:$0xff] %v731_v20  ;;  %794 = vst [vmem:[%s1231_s18 + $0xe8] sm:$0xff] %v730_v21  ;;  %v655_v27 = vadd.f32 %v654_v25, %v293_v19  ;;  %v496_v28 = vadd.f32 %v495_v26, %v293_v19  ;;  %v656_v29 = vpop.f32.mrb[17].mxu1  ;;  %v318_v20 = vpop.permute.xlu1 %317 }
 0x10f   : > { %796 = vst [vmem:[%s1231_s18 + $0xf8] sm:$0xff] %v732_v23  ;;  %v733_v30 = vmax.f32 %v494_v24, 0.0  ;;  %v657_v31 = vadd.f32 %v656_v29, %v293_v19 }
 0x110   : > { %v735_v33 = vmax.f32 %v655_v27, 0.0  ;;  %v734_v34 = vmax.f32 %v496_v28, 0.0  ;;  %v499_v35 = vpop.f32.mrb[18].mxu0 }
 0x111   : > { %797 = vst [vmem:[%s1231_s18 + $0x100] sm:$0xff] %v733_v30  ;;  %v736_v36 = vmax.f32 %v657_v31, 0.0  ;;  %v500_v37 = vadd.f32 %v499_v35, %v298_v32  ;;  %v660_v38 = vpop.f32.mrb[18].mxu1  ;;  %v501_v39 = vpop.f32.mrb[19].mxu0 }
 0x112   : > { %799 = vst [vmem:[%s1231_s18 + $0x110] sm:$0xff] %v735_v33  ;;  %798 = vst [vmem:[%s1231_s18 + $0x108] sm:$0xff] %v734_v34  ;;  %v661_v40 = vadd.f32 %v660_v38, %v298_v32  ;;  %v502_v41 = vadd.f32 %v501_v39, %v298_v32  ;;  %v662_v42 = vpop.f32.mrb[19].mxu1  ;;  %v323_v33 = vpop.permute.xlu0 %322 }
 0x113   : > { %800 = vst [vmem:[%s1231_s18 + $0x118] sm:$0xff] %v736_v36  ;;  %v737_v43 = vmax.f32 %v500_v37, 0.0  ;;  %v663_v44 = vadd.f32 %v662_v42, %v298_v32 }
 0x114   : > { %v739_v46 = vmax.f32 %v661_v40, 0.0  ;;  %v738_v47 = vmax.f32 %v502_v41, 0.0  ;;  %v505_v48 = vpop.f32.mrb[20].mxu0 }
 0x115   : > { %801 = vst [vmem:[%s1231_s18 + $0x120] sm:$0xff] %v737_v43  ;;  %v740_v49 = vmax.f32 %v663_v44, 0.0  ;;  %v506_v50 = vadd.f32 %v505_v48, %v303_v45  ;;  %v666_v51 = vpop.f32.mrb[20].mxu1  ;;  %v507_v52 = vpop.f32.mrb[21].mxu0 }
 0x116   : > { %803 = vst [vmem:[%s1231_s18 + $0x130] sm:$0xff] %v739_v46  ;;  %802 = vst [vmem:[%s1231_s18 + $0x128] sm:$0xff] %v738_v47  ;;  %v667_v53 = vadd.f32 %v666_v51, %v303_v45  ;;  %v508_v54 = vadd.f32 %v507_v52, %v303_v45  ;;  %v668_v55 = vpop.f32.mrb[21].mxu1  ;;  %v328_v46 = vpop.permute.xlu1 %327 }
 0x117   : > { %804 = vst [vmem:[%s1231_s18 + $0x138] sm:$0xff] %v740_v49  ;;  %v741_v56 = vmax.f32 %v506_v50, 0.0  ;;  %v669_v57 = vadd.f32 %v668_v55, %v303_v45 }
 0x118   : > { %v743_v59 = vmax.f32 %v667_v53, 0.0  ;;  %v742_v60 = vmax.f32 %v508_v54, 0.0  ;;  %v511_v61 = vpop.f32.mrb[22].mxu0 }
 0x119   : > { %805 = vst [vmem:[%s1231_s18 + $0x140] sm:$0xff] %v741_v56  ;;  %v744_v62 = vmax.f32 %v669_v57, 0.0  ;;  %v512_v63 = vadd.f32 %v511_v61, %v308_v58  ;;  %v672_v0 = vpop.f32.mrb[22].mxu1  ;;  %v513_v1 = vpop.f32.mrb[23].mxu0 }
 0x11a   : > { %807 = vst [vmem:[%s1231_s18 + $0x150] sm:$0xff] %v743_v59  ;;  %806 = vst [vmem:[%s1231_s18 + $0x148] sm:$0xff] %v742_v60  ;;  %v673_v2 = vadd.f32 %v672_v0, %v308_v58  ;;  %v514_v3 = vadd.f32 %v513_v1, %v308_v58  ;;  %v674_v4 = vpop.f32.mrb[23].mxu1 }
 0x11b   : > { %808 = vst [vmem:[%s1231_s18 + $0x158] sm:$0xff] %v744_v62  ;;  %v745_v5 = vmax.f32 %v512_v63, 0.0  ;;  %v675_v6 = vadd.f32 %v674_v4, %v308_v58 }
 0x11c   : > { %v747_v8 = vmax.f32 %v673_v2, 0.0  ;;  %v746_v9 = vmax.f32 %v514_v3, 0.0  ;;  %v517_v10 = vpop.f32.mrb[24].mxu0 }
 0x11d   : > { %809 = vst [vmem:[%s1231_s18 + $0x160] sm:$0xff] %v745_v5  ;;  %v748_v11 = vmax.f32 %v675_v6, 0.0  ;;  %v518_v12 = vadd.f32 %v517_v10, %v313_v7  ;;  %v678_v13 = vpop.f32.mrb[24].mxu1  ;;  %v519_v14 = vpop.f32.mrb[25].mxu0 }
 0x11e   : > { %811 = vst [vmem:[%s1231_s18 + $0x170] sm:$0xff] %v747_v8  ;;  %810 = vst [vmem:[%s1231_s18 + $0x168] sm:$0xff] %v746_v9  ;;  %v679_v15 = vadd.f32 %v678_v13, %v313_v7  ;;  %v520_v16 = vadd.f32 %v519_v14, %v313_v7  ;;  %v680_v17 = vpop.f32.mrb[25].mxu1 }
 0x11f   : > { %812 = vst [vmem:[%s1231_s18 + $0x178] sm:$0xff] %v748_v11  ;;  %v749_v18 = vmax.f32 %v518_v12, 0.0  ;;  %v681_v19 = vadd.f32 %v680_v17, %v313_v7 }
 0x120   : > { %v751_v21 = vmax.f32 %v679_v15, 0.0  ;;  %v750_v22 = vmax.f32 %v520_v16, 0.0  ;;  %v523_v23 = vpop.f32.mrb[26].mxu0 }
 0x121   : > { %813 = vst [vmem:[%s1231_s18 + $0x180] sm:$0xff] %v749_v18  ;;  %v752_v24 = vmax.f32 %v681_v19, 0.0  ;;  %v524_v25 = vadd.f32 %v523_v23, %v318_v20  ;;  %v684_v26 = vpop.f32.mrb[26].mxu1  ;;  %v525_v27 = vpop.f32.mrb[27].mxu0 }
 0x122   : > { %815 = vst [vmem:[%s1231_s18 + $0x190] sm:$0xff] %v751_v21  ;;  %814 = vst [vmem:[%s1231_s18 + $0x188] sm:$0xff] %v750_v22  ;;  %v685_v28 = vadd.f32 %v684_v26, %v318_v20  ;;  %v526_v29 = vadd.f32 %v525_v27, %v318_v20  ;;  %v686_v30 = vpop.f32.mrb[27].mxu1 }
 0x123   : > { %816 = vst [vmem:[%s1231_s18 + $0x198] sm:$0xff] %v752_v24  ;;  %v753_v31 = vmax.f32 %v524_v25, 0.0  ;;  %v687_v32 = vadd.f32 %v686_v30, %v318_v20 }
 0x124   : > { %v755_v34 = vmax.f32 %v685_v28, 0.0  ;;  %v754_v35 = vmax.f32 %v526_v29, 0.0  ;;  %v529_v36 = vpop.f32.mrb[28].mxu0 }
 0x125   : > { %817 = vst [vmem:[%s1231_s18 + $0x1a0] sm:$0xff] %v753_v31  ;;  %v756_v37 = vmax.f32 %v687_v32, 0.0  ;;  %v530_v38 = vadd.f32 %v529_v36, %v323_v33  ;;  %v690_v39 = vpop.f32.mrb[28].mxu1  ;;  %v531_v40 = vpop.f32.mrb[29].mxu0 }
 0x126   : > { %819 = vst [vmem:[%s1231_s18 + $0x1b0] sm:$0xff] %v755_v34  ;;  %818 = vst [vmem:[%s1231_s18 + $0x1a8] sm:$0xff] %v754_v35  ;;  %v691_v41 = vadd.f32 %v690_v39, %v323_v33  ;;  %v532_v42 = vadd.f32 %v531_v40, %v323_v33  ;;  %v692_v43 = vpop.f32.mrb[29].mxu1 }
 0x127   : > { %820 = vst [vmem:[%s1231_s18 + $0x1b8] sm:$0xff] %v756_v37  ;;  %v757_v44 = vmax.f32 %v530_v38, 0.0  ;;  %v693_v45 = vadd.f32 %v692_v43, %v323_v33 }
 0x128   : > { %v759_v47 = vmax.f32 %v691_v41, 0.0  ;;  %v758_v48 = vmax.f32 %v532_v42, 0.0  ;;  %v535_v49 = vpop.f32.mrb[30].mxu0 }
 0x129   : > { %821 = vst [vmem:[%s1231_s18 + $0x1c0] sm:$0xff] %v757_v44  ;;  %v760_v50 = vmax.f32 %v693_v45, 0.0  ;;  %v536_v51 = vadd.f32 %v535_v49, %v328_v46  ;;  %v696_v52 = vpop.f32.mrb[30].mxu1  ;;  %v537_v53 = vpop.f32.mrb[31].mxu0 }
 0x12a   : > { %823 = vst [vmem:[%s1231_s18 + $0x1d0] sm:$0xff] %v759_v47  ;;  %822 = vst [vmem:[%s1231_s18 + $0x1c8] sm:$0xff] %v758_v48  ;;  %v697_v54 = vadd.f32 %v696_v52, %v328_v46  ;;  %v538_v55 = vadd.f32 %v537_v53, %v328_v46  ;;  %v698_v56 = vpop.f32.mrb[31].mxu1 }
 0x12b   : > { %824 = vst [vmem:[%s1231_s18 + $0x1d8] sm:$0xff] %v760_v50  ;;  %v761_v57 = vmax.f32 %v536_v51, 0.0  ;;  %v699_v58 = vadd.f32 %v698_v56, %v328_v46 }
 0x12c   : > { %v763_v59 = vmax.f32 %v697_v54, 0.0  ;;  %v762_v60 = vmax.f32 %v538_v55, 0.0 }
 0x12d   : > { %825 = vst [vmem:[%s1231_s18 + $0x1e0] sm:$0xff] %v761_v57  ;;  %v764_v61 = vmax.f32 %v699_v58, 0.0 }
 0x12e   : > { %827 = vst [vmem:[%s1231_s18 + $0x1f0] sm:$0xff] %v763_v59  ;;  %826 = vst [vmem:[%s1231_s18 + $0x1e8] sm:$0xff] %v762_v60 }
 0x12f   : > { %828 = vst [vmem:[%s1231_s18 + $0x1f8] sm:$0xff] %v764_v61 }
 0x130 PF: > { %s13_s14 = sadd.s32 1, %s1019_s14   ;;  %s1310_s12 = smov %s1015_s13 }
 0x131   : > { %p10_p5 = scmp.ge.s32.totalorder %s13_s14, 4   ;;  %s1311_s13 = smov %s1313_s15 }
 0x133   :  { %12 = sbr.rel (!%p10_p5) target bundleno = 2 (0x2), region = 62 }

</bundles_post_ra>
